<compile_context>
chip_gen: v7x
topology: tpu7x:2x2x1
jax: 0.10.0
libtpu: 0.0.40
codegen_flags: <defaults>
</compile_context>

<pallas_src>
import functools

import jax
import jax.numpy as jnp
from jax.experimental import pallas as pl
from jax.experimental.pallas import tpu as pltpu


# ------------------------------ roll-direction probe -------------------------

@functools.cache
def _roll_matches_jnp() -> bool:
    """One-time probe of pltpu.roll's rotate convention.

    We need shifted[:, p] = x[:, (p + d) % n]; building the shift amount from the
    probed direction keeps the im2col correct under either rotate convention.
    """
    def k(x_ref, o_ref):
        o_ref[...] = pltpu.roll(x_ref[...], 1, axis=1)

    x = jnp.broadcast_to(jnp.arange(128, dtype=jnp.float32), (8, 128))
    y = pl.pallas_call(k, out_shape=jax.ShapeDtypeStruct((8, 128), jnp.float32))(x)
    return bool(y[0, 1] == 0.0)          # jnp.roll(x, 1) puts x[..., 0] at lane 1


# ------------------------------ fused kernel ---------------------------------

def _siu_fused_kernel(l_ref, m_ref, s_ref, pool_ref, up_ref,
                      maskl_ref, maskm_ref, masks_ref,
                      w5_ref, w3p_ref, wsp_ref, wt0_ref, wt1_ref, wt2_ref,
                      wt3_ref, bias_ref, o_ref, xcol_ref,
                      *, cp, hl, wl, hm, wm, hs, ws, kh, kw, roll_like_jnp):
    nl, nm, ns = hl * wl, hm * wm, hs * ws
    bstride = 3 * cp

    def bias(i, rows):
        # all biases packed in one (7*3cp, 1) f32 column, stride 3cp per entry
        return bias_ref[i * bstride:i * bstride + rows, :]

    def shift_left(x, d, n):
        """y[:, p] = x[:, (p + d) % n]   (static d, XLU roll when lane-aligned)."""
        d = d % n
        if d == 0:
            return x
        if n % 128 == 0:
            amt = (n - d) if roll_like_jnp else d
            return pltpu.roll(x, amt, axis=1)
        # tiny-n fallback (e.g. the 8x8 small scale, 64 lanes)
        return jnp.concatenate([x, x], axis=1)[:, d:d + n]

    def conv(x, w_ref, b, mask_ref, H, W, K, relu=True):
        """'same' KxK conv: roll+mask taps into the shared VMEM scratch, then one
        bf16 MXU dot against the BN-folded (rows_out, K*K*rows_in) weight."""
        rows_in, n = x.shape
        r = (K - 1) // 2
        t = 0
        for dh in range(-r, r + 1):
            for dw in range(-r, r + 1):
                sh = shift_left(x, dh * W + dw, n)
                if not (dh == 0 and dw == 0):
                    sh = sh * mask_ref[t:t + 1, :]       # zero out-of-image taps
                xcol_ref[t * rows_in:(t + 1) * rows_in, :n] = sh
                t += 1
        xcol = xcol_ref[:K * K * rows_in, :n].astype(jnp.bfloat16)
        y = jnp.dot(w_ref[...], xcol, preferred_element_type=jnp.float32) + b
        return jnp.maximum(y, 0.0) if relu else y

    def conv1x1(x, w_ref, b, relu=True):
        y = jnp.dot(w_ref[...], x.astype(jnp.bfloat16),
                    preferred_element_type=jnp.float32) + b
        return jnp.maximum(y, 0.0) if relu else y

    # ---- large branch: 5x5 conv, then max+avg pool via rolls + ONE matmul ----
    lx5 = conv(l_ref[0], w5_ref, bias(0, cp), maskl_ref, hl, wl, 5)   # (cp, nl)
    pmax, psum = lx5, lx5
    for di in range(kh):
        for dj in range(kw):
            if di == 0 and dj == 0:
                continue
            sh = shift_left(lx5, di * wl + dj, nl)
            pmax = jnp.maximum(pmax, sh)
            psum = psum + sh
    pooled_full = pmax + psum * (1.0 / (kh * kw))   # only window anchors matter
    pooled = jnp.dot(pooled_full.astype(jnp.bfloat16), pool_ref[...],
                     preferred_element_type=jnp.float32)              # (cp, nm)

    # ---- small branch: 3x3 conv at small res, nearest upsample via matmul ----
    sx3 = conv(s_ref[0], wsp_ref, bias(2, cp), masks_ref, hs, ws, 3)  # (cp, ns)
    sup = jnp.dot(sx3.astype(jnp.bfloat16), up_ref[...],
                  preferred_element_type=jnp.float32)                 # (cp, nm)

    # ---- three resolution-matched 3x3 convs as ONE block-diagonal MXU dot ----
    x3 = jnp.concatenate([pooled, m_ref[0], sup], axis=0)             # (3cp, nm)
    y3 = conv(x3, w3p_ref, bias(1, 3 * cp), maskm_ref, hm, wm, 3)     # (3cp, nm)
    lx, mx, sx = y3[0:cp], y3[cp:2 * cp], y3[2 * cp:3 * cp]

    # ---- attention trans: 1x1 -> 3x3 -> 3x3 -> 1x1 (no ReLU) ----------------
    a = conv1x1(y3, wt0_ref, bias(3, cp))
    a = conv(a, wt1_ref, bias(4, cp), maskm_ref, hm, wm, 3)
    a = conv(a, wt2_ref, bias(5, cp), maskm_ref, hm, wm, 3)
    a = conv1x1(a, wt3_ref, bias(6, cp), relu=False)                  # rows 0..2

    # ---- softmax over the 3 attention planes (sublanes) + weighted fuse -----
    a0, a1, a2 = a[0:1, :], a[1:2, :], a[2:3, :]
    amax = jnp.maximum(jnp.maximum(a0, a1), a2)
    e0 = jnp.exp(a0 - amax)
    e1 = jnp.exp(a1 - amax)
    e2 = jnp.exp(a2 - amax)
    inv = pl.reciprocal(e0 + e1 + e2, approx=True)
    out = (e0 * inv) * lx + (e1 * inv) * mx + (e2 * inv) * sx
    o_ref[0] = out.astype(o_ref.dtype)


# ------------------------------ host-side constants --------------------------

def _fold_conv(pr, cpad, groups=1):
    """Fold BN scale into weights, pad channels to cpad, flatten for the MXU dot.

    pr["w"]: (KH, KW, Cin, Cout) HWIO; returns w2d (cpad, KH*KW*groups*cpad)
    with contraction ordered (kh, kw, group, padded-cin), and bias (cpad,).
    """
    w, scale, b = pr["w"], pr["scale"], pr["bias"]
    KH, KW, Cin, Cout = w.shape
    gin = Cin // groups
    wg = w.reshape(KH, KW, groups, gin, Cout)
    wg = jnp.pad(wg, ((0, 0), (0, 0), (0, 0),
                      (0, cpad - gin), (0, cpad - Cout)))
    w2d = jnp.transpose(wg, (4, 0, 1, 2, 3)).reshape(cpad, KH * KW * groups * cpad)
    sc = jnp.pad(jnp.reshape(scale, (-1,)), (0, cpad - Cout))
    bs = jnp.pad(jnp.reshape(b, (-1,)), (0, cpad - Cout))
    return w2d * sc[:, None], bs


def _block_diag3(w_list, cpad, K):
    """Pack three same-size folded 3x3 convs into one block-diagonal weight."""
    KK = K * K
    out = jnp.zeros((3 * cpad, KK, 3 * cpad), jnp.float32)
    for g, wg in enumerate(w_list):
        out = out.at[g * cpad:(g + 1) * cpad, :, g * cpad:(g + 1) * cpad].set(
            wg.reshape(cpad, KK, cpad))
    return out.reshape(3 * cpad, KK * 3 * cpad)


def _conv_mask(H, W, K):
    """(K*K, H*W) 0/1 boundary masks for the rolled im2col taps."""
    r = (K - 1) // 2
    p = jnp.arange(H * W)
    row, col = p // W, p % W
    rows = []
    for dh in range(-r, r + 1):
        for dw in range(-r, r + 1):
            ok = ((col + dw >= 0) & (col + dw < W) &
                  (row + dh >= 0) & (row + dh < H))
            rows.append(ok)
    return jnp.stack(rows).astype(jnp.float32)


def _pool_select(hl, wl, hm, wm):
    """0/1 matrix picking the top-left (anchor) element of each pooling window."""
    kh, kw = hl // hm, wl // wm
    p = jnp.arange(hm * wm)
    base = (p // wm) * (kh * wl) + (p % wm) * kw
    q = jnp.arange(hl * wl)
    return (q[:, None] == base[None, :]).astype(jnp.float32)


def _upsample_select(hs, ws, hm, wm):
    """0/1 matrix implementing nearest-neighbour resize (floor rule)."""
    p = jnp.arange(hm * wm)
    src = ((p // wm) * hs // hm) * ws + ((p % wm) * ws // wm)
    q = jnp.arange(hs * ws)
    return (q[:, None] == src[None, :]).astype(jnp.float32)


# ------------------------------ forward wrapper -------------------------------

def siu_forward(params, l, m, s):
    """l, m, s: NCHW float32 (like the PyTorch module). Returns NCHW (m-sized)."""
    return _siu_forward(params, l, m, s, _roll_matches_jnp())


@functools.partial(jax.jit, static_argnums=(4,))
def _siu_forward(params, l, m, s, roll_like_jnp):
    B, C, hl, wl = l.shape
    _, _, hm, wm = m.shape
    _, _, hs, ws = s.shape
    # TODO(synk): only exact-multiple adaptive-pool ratios are kernelized
    # (the case SIU hits: l is an integer multiple of m's size).
    assert hl % hm == 0 and wl % wm == 0
    kh, kw = hl // hm, wl // wm

    cp = max(8, -(-C // 8) * 8)            # pad channels to a sublane tile
    nl, nm, ns = hl * wl, hm * wm, hs * ws
    nmax = max(nl, nm, ns)
    bf16 = jnp.bfloat16

    def pad_flat(x, n):                    # NCHW -> (B, Cpad, H*W), zero-padded
        x = jnp.pad(x, ((0, 0), (0, cp - C), (0, 0), (0, 0)))
        return x.reshape(B, cp, n)

    lf, mf, sf = pad_flat(l, nl), pad_flat(m, nm), pad_flat(s, ns)

    # 0/1 selection matrices are exact in bf16 -> half the DMA/VMEM, native MXU.
    # TODO(synk): for very large resolutions these dense O(N_l*N_m) selections
    # should be factorized per-row/per-column; kept dense-bf16 at these sizes.
    pool_sel = _pool_select(hl, wl, hm, wm).astype(bf16)
    up_sel = _upsample_select(hs, ws, hm, wm).astype(bf16)
    mask_l = _conv_mask(hl, wl, 5)
    mask_m = _conv_mask(hm, wm, 3)
    mask_s = _conv_mask(hs, ws, 3)

    w5, b5 = _fold_conv(params["conv_l_pre_down"], cp)
    wlp, blp = _fold_conv(params["conv_l_post_down"], cp)
    wmc, bmc = _fold_conv(params["conv_m"], cp)
    wsu, bsu = _fold_conv(params["conv_s_post_up"], cp)
    wsp, bsp = _fold_conv(params["conv_s_pre_up"], cp)
    wt0, bt0 = _fold_conv(params["trans0"], cp, groups=3)
    wt1, bt1 = _fold_conv(params["trans1"], cp)
    wt2, bt2 = _fold_conv(params["trans2"], cp)
    wt3, bt3 = _fold_conv(params["trans3"], cp)

    # one block-diagonal weight for the three resolution-matched 3x3 convs
    w3p = _block_diag3([wlp, wmc, wsu], cp, 3)
    b3p = jnp.concatenate([blp, bmc, bsu])

    # pack all biases into one (7*3cp, 1) column (stride 3cp per conv entry)
    bstride = 3 * cp
    bias = jnp.zeros((7 * bstride, 1), jnp.float32)
    for i, b in enumerate((b5, b3p, bsp, bt0, bt1, bt2, bt3)):
        bias = bias.at[i * bstride:i * bstride + b.shape[0], 0].set(b)

    weights = [w5.astype(bf16), w3p.astype(bf16), wsp.astype(bf16),
               wt0.astype(bf16), wt1.astype(bf16), wt2.astype(bf16),
               wt3.astype(bf16)]
    consts = [pool_sel, up_sel, mask_l, mask_m, mask_s] + weights + [bias]

    kern = functools.partial(_siu_fused_kernel, cp=cp, hl=hl, wl=wl, hm=hm,
                             wm=wm, hs=hs, ws=ws, kh=kh, kw=kw,
                             roll_like_jnp=roll_like_jnp)

    def const_spec(a):
        nd = a.ndim
        return pl.BlockSpec(a.shape, lambda b, _nd=nd: (0,) * _nd)

    in_specs = [
        pl.BlockSpec((1, cp, nl), lambda b: (b, 0, 0)),
        pl.BlockSpec((1, cp, nm), lambda b: (b, 0, 0)),
        pl.BlockSpec((1, cp, ns), lambda b: (b, 0, 0)),
    ] + [const_spec(a) for a in consts]

    # shared im2col scratch: 27*cp rows covers the 5x5 (25*cp) and the packed
    # 3-way 3x3 (9*3cp) convs; lanes sized for the largest scale.
    scratch_rows = 27 * cp
    scratch_bytes = scratch_rows * nmax * 4
    const_bytes = sum(int(a.size) * a.dtype.itemsize for a in consts)
    io_bytes = 4 * cp * (nl + 2 * nm + ns)
    vmem_limit = int(min(64 * 2**20,
                         max(24 * 2**20,
                             2 * (const_bytes + io_bytes) + 6 * scratch_bytes)))

    out = pl.pallas_call(
        kern,
        out_shape=jax.ShapeDtypeStruct((B, cp, nm), jnp.float32),
        grid_spec=pltpu.PrefetchScalarGridSpec(
            num_scalar_prefetch=0,
            grid=(B,),
            in_specs=in_specs,
            out_specs=pl.BlockSpec((1, cp, nm), lambda b: (b, 0, 0)),
            scratch_shapes=[pltpu.VMEM((scratch_rows, nmax), jnp.float32)],
        ),
        compiler_params=pltpu.CompilerParams(
            dimension_semantics=("parallel",),
            vmem_limit_bytes=vmem_limit),
    )(lf, mf, sf, *consts)

    return out[:, :C].reshape(B, C, hm, wm)


# --------------------------- parameters / reference ---------------------------

def _init_cbr(key, kh, kw, cin, cout):
    kw_, ks, kb = jax.random.split(key, 3)
    fan_in = kh * kw * cin
    w = jax.random.normal(kw_, (kh, kw, cin, cout), jnp.float32) * (fan_in ** -0.5)
    # BatchNorm (eval mode) folded into affine scale/bias.
    scale = 1.0 + 0.05 * jax.random.normal(ks, (1, cout), jnp.float32)
    bias = 0.05 * jax.random.normal(kb, (1, cout), jnp.float32)
    return dict(w=w, scale=scale, bias=bias)


def init_siu_params(key, in_dim):
    keys = jax.random.split(key, 10)
    p = {
        "conv_l_pre_down": _init_cbr(keys[0], 5, 5, in_dim, in_dim),
        "conv_l_post_down": _init_cbr(keys[1], 3, 3, in_dim, in_dim),
        "conv_m": _init_cbr(keys[2], 3, 3, in_dim, in_dim),
        "conv_s_pre_up": _init_cbr(keys[3], 3, 3, in_dim, in_dim),
        "conv_s_post_up": _init_cbr(keys[4], 3, 3, in_dim, in_dim),
        "trans0": _init_cbr(keys[5], 1, 1, 3 * in_dim, in_dim),
        "trans1": _init_cbr(keys[6], 3, 3, in_dim, in_dim),
        "trans2": _init_cbr(keys[7], 3, 3, in_dim, in_dim),
    }
    # Final nn.Conv2d(in_dim, 3, 1): has bias, no BN, no ReLU.
    wt = jax.random.normal(keys[8], (1, 1, in_dim, 3), jnp.float32) * (in_dim ** -0.5)
    bt = 0.05 * jax.random.normal(keys[9], (1, 3), jnp.float32)
    p["trans3"] = dict(w=wt, scale=jnp.ones((1, 3), jnp.float32), bias=bt)
    # NOTE: c1_down..c5_down from __init__ are dead code (never used in forward).
    return p


def _ref_forward(params, l, m, s):
    """Pure-JAX (XLA, f32) reference of the SIU forward, NCHW, for verification."""
    def cbr(x, pr, relu=True):
        y = jax.lax.conv_general_dilated(
            x, pr["w"], (1, 1), "SAME",
            dimension_numbers=("NCHW", "HWIO", "NCHW"))
        y = y * pr["scale"].reshape(1, -1, 1, 1) + pr["bias"].reshape(1, -1, 1, 1)
        return jnp.maximum(y, 0.0) if relu else y

    tgt = m.shape[2:]
    l = cbr(l, params["conv_l_pre_down"])
    kh, kw = l.shape[2] // tgt[0], l.shape[3] // tgt[1]
    mxp = jax.lax.reduce_window(l, -jnp.inf, jax.lax.max,
                                (1, 1, kh, kw), (1, 1, kh, kw), "VALID")
    avp = jax.lax.reduce_window(l, 0.0, jax.lax.add,
                                (1, 1, kh, kw), (1, 1, kh, kw), "VALID") / (kh * kw)
    l = cbr(mxp + avp, params["conv_l_post_down"])
    m = cbr(m, params["conv_m"])
    s = cbr(s, params["conv_s_pre_up"])
    rows = (jnp.arange(tgt[0]) * s.shape[2]) // tgt[0]
    cols = (jnp.arange(tgt[1]) * s.shape[3]) // tgt[1]
    s = s[:, :, rows][:, :, :, cols]
    s = cbr(s, params["conv_s_post_up"])
    attn = jnp.concatenate([l, m, s], axis=1)
    attn = cbr(attn, params["trans0"])
    attn = cbr(attn, params["trans1"])
    attn = cbr(attn, params["trans2"])
    attn = cbr(attn, params["trans3"], relu=False)
    p = jax.nn.softmax(attn, axis=1)
    return p[:, 0:1] * l + p[:, 1:2] * m + p[:, 2:3] * s


# --------------------------------- main ---------------------------------------

if __name__ == "__main__":
    B, C = 2, 4
    Hm = Wm = 16
    key = jax.random.PRNGKey(0)
    k_l, k_m, k_s, k_p = jax.random.split(key, 4)
    # l is the large scale (2x m), s the small scale (0.5x m), m the target.
    l = jax.random.normal(k_l, (B, C, 2 * Hm, 2 * Wm), jnp.float32)
    m = jax.random.normal(k_m, (B, C, Hm, Wm), jnp.float32)
    s = jax.random.normal(k_s, (B, C, Hm // 2, Wm // 2), jnp.float32)

    params = init_siu_params(k_p, C)

    out = jax.block_until_ready(siu_forward(params, l, m, s))
    ref = jax.block_until_ready(jax.jit(_ref_forward)(params, l, m, s))

    assert out.shape == (B, C, Hm, Wm)
    assert bool(jnp.all(jnp.isfinite(out)))
    err = float(jnp.max(jnp.abs(out - ref)))
    ref_mag = float(jnp.max(jnp.abs(ref)))
    # bf16 MXU operands (f32 accumulation) vs an all-f32 reference: allow a few
    # percent of the output range; a structural bug would be an O(ref_mag) error.
    assert err <= 8e-2 + 3e-2 * ref_mag, f"mismatch: err={err} ref_mag={ref_mag}"
    print("KERNEL_OK")
</pallas_src>

<mosaic_0001>
module attributes {stable_mosaic.version = 11 : i64} {
  func.func @k(%arg0: memref<8x128xf32, #tpu.memory_space<vmem>>, %arg1: memref<8x128xf32, #tpu.memory_space<vmem>>) attributes {dimension_semantics = [], scalar_prefetch = 0 : i64, scratch_operands = 0 : i64, tpu.core_type = #tpu.core_type<tc>} {
    %c0 = arith.constant 0 : index
    %c0_0 = arith.constant 0 : index
    %0 = vector.load %arg0[%c0, %c0_0] : memref<8x128xf32, #tpu.memory_space<vmem>>, vector<8x128xf32>
    %c1_i32 = arith.constant 1 : i32
    %1 = tpu.dynamic_rotate %0 by %c1_i32 dim 1 : vector<8x128xf32>, i32 -> vector<8x128xf32>
    %c0_1 = arith.constant 0 : index
    %c0_2 = arith.constant 0 : index
    %2 = vector.load %arg1[%c0_1, %c0_2] : memref<8x128xf32, #tpu.memory_space<vmem>>, vector<8x128xf32>
    tpu.vector_store %arg1[%c0_1, %c0_2], %1 {strides = array<i32>} : memref<8x128xf32, #tpu.memory_space<vmem>>, vector<8x128xf32>,
    return
  }
}

</mosaic_0001>

<bundles_post_ra>
// kernel: tpu_custom_call.1
= control target key start
LH: loop header
LB: loop body
LE: loop exit
PB: predicated region body
PF: predicated region fallthrough
CT: control target
= control target key end

     0   :  { %6 = vsyncpa [#allocation3], 0  ;;  %s128_s0 = inlined_call_operand.hbm [shape: f32[8,128], index: 0, kind: input, shape index: {}]   ;;  %s129_s1 = inlined_call_operand.hbm [shape: f32[8,128], index: 1, kind: output, shape index: {}]  }
   0x1   :  { %7 = vsyncpa [#allocation4], 0  ;;  %s91_s6 = smov [#allocation2]   ;;  %s43_s10 = scalar_lea.hbm %s128_s0, 128 }
   0x2   :  { %s14_s7 = sshll.u32 %s91_s6, 4  ;;  %p44_p0 = scmp.ne.s32.totalorder %s128_s0, %s43_s10  ;;  %s15_s7 = int_to_ptr.vmem [resolvable:$true] %s14_s7 }
   0x3   :  { %p47_p1 = scmp.lt.u32.totalorder %s43_s10, %s128_s0 }
   0x5   :  { %p49_p2 = pnand %p47_p1, %p44_p0 }
   0x7   :  { %52 = shalt.err (!%p49_p2)
}
   0x8   :  { %s53_s15 = scalar_lea.vmem %s15_s7, 128  ;;  %p58_p4 = scmp.lt.s32.totalorder %s15_s7, %s15_s7 }
   0x9   :  { %p54_p3 = scmp.ne.s32.totalorder %s15_s7, %s53_s15  ;;  %p59_p5 = scmp.lt.s32.totalorder %s53_s15, %s53_s15 }
   0xb   :  { %p60_p6 = por %p59_p5, %p58_p4 }
   0xd   :  { %p61_p7 = pnand %p60_p6, %p54_p3 }
   0xf   :  { %64 = shalt.err (!%p61_p7)
}
  0x10   :  { %17 = dma.hbm_to_vmem [thread:$0]  %s128_s0, 128, %s15_s7, [#allocation3]  }
  0x11   :  { %87 = dma.done.wait [#allocation3], 128  }
  0x12   :  { %88 = vsyncadd [#allocation3], 4294967168  ;;  %v21_v0 = vld [vmem:[#allocation2] sm:$0xff]  ;;  %s92_s18 = smov 1   ;;  %s93_s19 = smov [#allocation5]  }
  0x13   :  { %22 = vrot.lane.b32.xlu0 %v21_v0, %s92_s18  ;;  %s31_s20 = sshll.u32 %s93_s19, 4  ;;  %s32_s20 = int_to_ptr.vmem [resolvable:$true] %s31_s20 }
  0x14   :  { %s65_s21 = scalar_lea.vmem %s32_s20, 128  ;;  %p70_p9 = scmp.lt.s32.totalorder %s32_s20, %s32_s20 }
  0x15   :  { %p66_p8 = scmp.ne.s32.totalorder %s32_s20, %s65_s21  ;;  %p71_p10 = scmp.lt.s32.totalorder %s65_s21, %s65_s21 }
  0x17   :  { %p72_p11 = por %p71_p10, %p70_p9 }
  0x19   :  { %p73_p12 = pnand %p72_p11, %p66_p8 }
  0x85   :  { %v23_v1 = vpop.permute.xlu0 %22 }
  0x86   :  { %24 = vst [vmem:[#allocation5] sm:$0xff] %v23_v1 }
  0x87   :  { %76 = shalt.err (!%p73_p12)
}
  0x88   :  { %s77_s0 = scalar_lea.hbm %s129_s1, 128 }
  0x89   :  { %p78_p13 = scmp.ne.s32.totalorder %s129_s1, %s77_s0  ;;  %p81_p0 = scmp.lt.u32.totalorder %s77_s0, %s129_s1 }
  0x8b   :  { %p83_p1 = pnand %p81_p0, %p78_p13 }
  0x8d   :  { %86 = shalt.err (!%p83_p1)
}
  0x8e   :  { %34 = dma.vmem_to_hbm [thread:$0]  %s32_s20, 128, %s129_s1, [#allocation4]  }
  0x8f   :  { %89 = dma.done.wait [#allocation4], 128  }
  0x90   :  { %90 = vsyncadd [#allocation4], 4294967168 }
  0x91   :  { %38 = vsyncpa [#allocation3], 1 }
  0x92   :  { %39 = vsyncpa [#allocation4], 1 }

</bundles_post_ra>
